<compile_context>
chip_gen: v5e
topology: v5e:2x2
jax: 0.10.0
libtpu: 0.0.40
codegen_flags: <defaults>
</compile_context>

<pallas_src>
import functools

import jax
import jax.numpy as jnp
from jax import lax
from jax.experimental import pallas as pl
from jax.experimental.pallas import tpu as pltpu

EPS = 1e-5  # InstanceNorm2d default eps


def _reflect_taps(a, H, W, masks):
    """Build the 9 reflection-padded 3x3 taps of `a`.

    a: (C, H*W) float32, spatial dims flattened lane-dense.
    Returns a list of 9 arrays (C, H*W) such that
      taps[ki*3 + kj][c, i*W + j] == reflect_pad1(a)[c, i + ki, j + kj].
    """
    HW = H * W
    is_row0, is_rowL, is_col0, is_colL = masks

    def roll(v, s):
        # pltpu.roll matches jnp.roll: out[k] = v[(k - s) mod HW] along lanes.
        return pltpu.roll(v, s % HW, axis=1)

    prev_row = roll(a, W)     # row i-1 (valid for i >= 1)
    next_row = roll(a, -W)    # row i+1 (valid for i <= H-2)
    row_shifted = (
        jnp.where(is_row0, next_row, prev_row),   # ki = 0 -> reads row i-1
        a,                                        # ki = 1 -> reads row i
        jnp.where(is_rowL, prev_row, next_row),   # ki = 2 -> reads row i+1
    )
    taps = []
    for rs in row_shifted:
        prev_col = roll(rs, 1)    # col j-1 (valid for j >= 1)
        next_col = roll(rs, -1)   # col j+1 (valid for j <= W-2)
        taps.append(jnp.where(is_col0, next_col, prev_col))  # kj = 0
        taps.append(rs)                                      # kj = 1
        taps.append(jnp.where(is_colL, prev_col, next_col))  # kj = 2
    return taps


def _conv3x3_instnorm(a, w, H, W, masks):
    """ReflectionPad1 + Conv3x3 (bias-free) + InstanceNorm for one sample.

    a: (Cin, H*W) f32.  w: (Cout, 9*Cin) bf16, K ordered tap-major/cin-minor.
    Returns (Cout, H*W) f32.
    """
    taps = _reflect_taps(a, H, W, masks)                    # 9 x (Cin, HW) f32
    k = jnp.concatenate(taps, axis=0).astype(jnp.bfloat16)  # (9*Cin, HW) bf16
    # Single long-K MXU contraction; accumulate in f32 inside the MXU.
    acc = jnp.dot(w, k, preferred_element_type=jnp.float32)  # (Cout, HW) f32
    # InstanceNorm2d (affine=False, biased variance), single pass in f32,
    # normalization folded into one scale/shift.
    inv_hw = 1.0 / (H * W)
    mean = jnp.sum(acc, axis=1, keepdims=True) * inv_hw
    var = jnp.sum(acc * acc, axis=1, keepdims=True) * inv_hw - mean * mean
    scale = lax.rsqrt(var + EPS)
    return acc * scale - mean * scale


def _residual_block_kernel(x_ref, w1_ref, w2_ref, o_ref, *, H, W):
    bn, C, HW = x_ref.shape
    # Boundary masks for reflection padding: computed once per grid step,
    # reused by both convs and all samples in the block.
    pos = lax.broadcasted_iota(jnp.int32, (C, HW), 1)
    colp = pos % W
    masks = (pos < W, pos >= HW - W, colp == 0, colp == W - 1)
    w1 = w1_ref[...]                                       # (C, 9C) bf16
    w2 = w2_ref[...]                                       # (C, 9C) bf16
    for s in range(bn):                                    # static, bn is small
        x = x_ref[s].astype(jnp.float32)                   # (C, HW) f32
        h = jnp.maximum(_conv3x3_instnorm(x, w1, H, W, masks), 0.0)  # conv1+IN+ReLU
        y = _conv3x3_instnorm(h, w2, H, W, masks)          # conv2 + IN
        o_ref[s] = (x + y).astype(o_ref.dtype)             # residual add


def _residual_block_pallas(x2, w1_k, w2_k, H, W, bn):
    N, C, HW = x2.shape
    kernel = functools.partial(_residual_block_kernel, H=H, W=W)
    return pl.pallas_call(
        kernel,
        out_shape=jax.ShapeDtypeStruct((N, C, HW), x2.dtype),
        grid=(N // bn,),
        in_specs=[
            # Lane-dense activations (HW multiple of 128 at these shapes).
            pl.BlockSpec((bn, C, HW), lambda n: (n, 0, 0)),
            # Weights: constant across the grid -> single resident VMEM copy
            # (no dead second pipeline buffer).
            pl.BlockSpec(memory_space=pltpu.MemorySpace.VMEM),
            pl.BlockSpec(memory_space=pltpu.MemorySpace.VMEM),
        ],
        out_specs=pl.BlockSpec((bn, C, HW), lambda n: (n, 0, 0)),
        compiler_params=pltpu.CompilerParams(
            dimension_semantics=("parallel",)),
    )(x2, w1_k, w2_k)


@jax.jit
def residual_block_forward(x, w1, b1, w2, b2):
    """x: (N, C, H, W); w*: (C, C, 3, 3); b*: (C,)."""
    # Conv biases are mathematically cancelled by the following
    # InstanceNorm2d(affine=False) mean subtraction -> dead work, dropped.
    del b1, b2
    N, C, H, W = x.shape
    x2 = x.reshape(N, C, H * W)                       # lane-dense activations
    # Fold the whole batch into one grid step when the activation block is
    # small (removes per-grid-step overhead); otherwise one sample per step
    # so megacore can shard over batch.
    bn = N if N * C * H * W * 4 <= (2 << 20) else 1
    # Weight slabs (Cout, 9*Cin), K ordered tap-major / cin-minor to match the
    # in-kernel tap concatenation; pre-cast to bf16 once (MXU-native).
    w1_k = jnp.transpose(w1, (0, 2, 3, 1)).reshape(C, 9 * C).astype(jnp.bfloat16)
    w2_k = jnp.transpose(w2, (0, 2, 3, 1)).reshape(C, 9 * C).astype(jnp.bfloat16)
    out = _residual_block_pallas(x2, w1_k, w2_k, H, W, bn)
    return out.reshape(N, C, H, W)


# ----------------------------- reference (pure JAX) -------------------------

def _reference_forward(x, w1, b1, w2, b2, conv_dtype=jnp.float32):
    def conv(xp, w, b):
        y = lax.conv_general_dilated(
            xp.astype(conv_dtype), w.astype(conv_dtype), (1, 1), "VALID",
            dimension_numbers=("NCHW", "OIHW", "NCHW"),
            preferred_element_type=jnp.float32)
        return y + b[None, :, None, None]

    def inorm(y):
        m = y.mean(axis=(2, 3), keepdims=True)
        v = ((y - m) ** 2).mean(axis=(2, 3), keepdims=True)
        return (y - m) * lax.rsqrt(v + EPS)

    pad = lambda t: jnp.pad(t, ((0, 0), (0, 0), (1, 1), (1, 1)),
                            mode="reflect")
    h = jnp.maximum(inorm(conv(pad(x), w1, b1)), 0.0)
    return x + inorm(conv(pad(h), w2, b2))


if __name__ == "__main__":
    N, C, H, W = 2, 4, 16, 16  # in_features = C = 4

    key = jax.random.PRNGKey(0)
    kx, kw1, kb1, kw2, kb2 = jax.random.split(key, 5)

    x = jax.random.normal(kx, (N, C, H, W), dtype=jnp.float32)
    w1 = 0.1 * jax.random.normal(kw1, (C, C, 3, 3), dtype=jnp.float32)
    b1 = 0.1 * jax.random.normal(kb1, (C,), dtype=jnp.float32)
    w2 = 0.1 * jax.random.normal(kw2, (C, C, 3, 3), dtype=jnp.float32)
    b2 = 0.1 * jax.random.normal(kb2, (C,), dtype=jnp.float32)

    out = jax.block_until_ready(residual_block_forward(x, w1, b1, w2, b2))
    assert out.shape == (N, C, H, W)

    # Tight check vs. a reference whose conv operands are also bf16 (isolates
    # structural errors from the intentional bf16 MXU cast).
    ref_bf16 = _reference_forward(x, w1, b1, w2, b2, conv_dtype=jnp.bfloat16)
    err_tight = float(jnp.max(jnp.abs(out - ref_bf16)))
    assert err_tight < 2e-3, err_tight

    # Loose check vs. the exact f32 reference (bf16 matmul operands in-kernel).
    ref_f32 = _reference_forward(x, w1, b1, w2, b2)
    err_loose = float(jnp.max(jnp.abs(out - ref_f32)))
    assert err_loose < 1e-1, err_loose

    print("KERNEL_OK")
</pallas_src>

<mosaic_0001>
module attributes {stable_mosaic.version = 11 : i64} {
  func.func @_residual_block_kernel(%arg0: i32, %arg1: memref<2x4x256xf32, #tpu.memory_space<vmem>>, %arg2: memref<4x36xbf16, #tpu.memory_space<vmem>>, %arg3: memref<4x36xbf16, #tpu.memory_space<vmem>>, %arg4: memref<2x4x256xf32, #tpu.memory_space<vmem>>) attributes {dimension_semantics = [#tpu.dimension_semantics<parallel>], iteration_bounds = array<i64: 1>, scalar_prefetch = 0 : i64, scratch_operands = 0 : i64, tpu.core_type = #tpu.core_type<tc>, window_params = [{transform_indices = @transform_0, window_bounds = array<i64: 2, 4, 256>}, {pipeline_mode = #tpu.pipeline_mode<synchronous>, transform_indices = @transform_1, window_bounds = array<i64: 4, 36>}, {pipeline_mode = #tpu.pipeline_mode<synchronous>, transform_indices = @transform_2, window_bounds = array<i64: 4, 36>}, {transform_indices = @transform_3, window_bounds = array<i64: 2, 4, 256>}]} {
    %0 = tpu.iota {dimensions = array<i32: 1>} : vector<4x256xi32>
    %c16_i32 = arith.constant 16 : i32
    %c0_i32 = arith.constant 0 : i32
    %1 = arith.cmpi eq, %c16_i32, %c0_i32 : i32
    %c1_i32 = arith.constant 1 : i32
    %2 = arith.select %1, %c1_i32, %c16_i32 : i32
    %3 = vector.broadcast %2 : i32 to vector<4x256xi32>
    %4 = arith.remsi %0, %3 : vector<4x256xi32>
    %c0_i32_0 = arith.constant 0 : i32
    %5 = vector.broadcast %c0_i32_0 : i32 to vector<4x256xi32>
    %6 = arith.cmpi ne, %4, %5 : vector<4x256xi32>
    %c0_i32_1 = arith.constant 0 : i32
    %7 = vector.broadcast %c0_i32_1 : i32 to vector<4x256xi32>
    %8 = arith.cmpi slt, %4, %7 : vector<4x256xi32>
    %c0_i32_2 = arith.constant 0 : i32
    %9 = arith.cmpi slt, %2, %c0_i32_2 : i32
    %10 = vector.broadcast %9 : i1 to vector<4x256xi1>
    %11 = vector.broadcast %10 : vector<4x256xi1> to vector<4x256xi1>
    %12 = arith.xori %8, %11 : vector<4x256xi1>
    %13 = arith.andi %12, %6 : vector<4x256xi1>
    %14 = vector.broadcast %2 : i32 to vector<4x256xi32>
    %15 = arith.addi %4, %14 : vector<4x256xi32>
    %16 = arith.select %13, %15, %4 : vector<4x256xi1>, vector<4x256xi32>
    %c16_i32_3 = arith.constant 16 : i32
    %17 = vector.broadcast %c16_i32_3 : i32 to vector<4x256xi32>
    %18 = arith.cmpi slt, %0, %17 : vector<4x256xi32>
    %c240_i32 = arith.constant 240 : i32
    %19 = vector.broadcast %c240_i32 : i32 to vector<4x256xi32>
    %20 = arith.cmpi sge, %0, %19 : vector<4x256xi32>
    %c0_i32_4 = arith.constant 0 : i32
    %21 = vector.broadcast %c0_i32_4 : i32 to vector<4x256xi32>
    %22 = arith.cmpi eq, %16, %21 : vector<4x256xi32>
    %c15_i32 = arith.constant 15 : i32
    %23 = vector.broadcast %c15_i32 : i32 to vector<4x256xi32>
    %24 = arith.cmpi eq, %16, %23 : vector<4x256xi32>
    %c0 = arith.constant 0 : index
    %c0_5 = arith.constant 0 : index
    %25 = vector.load %arg2[%c0, %c0_5] : memref<4x36xbf16, #tpu.memory_space<vmem>>, vector<4x36xbf16>
    %c0_6 = arith.constant 0 : index
    %c0_7 = arith.constant 0 : index
    %26 = vector.load %arg3[%c0_6, %c0_7] : memref<4x36xbf16, #tpu.memory_space<vmem>>, vector<4x36xbf16>
    %c0_8 = arith.constant 0 : index
    %c0_9 = arith.constant 0 : index
    %c0_10 = arith.constant 0 : index
    %27 = vector.load %arg1[%c0_8, %c0_9, %c0_10] : memref<2x4x256xf32, #tpu.memory_space<vmem>>, vector<1x4x256xf32>
    %28 = vector.shape_cast %27 : vector<1x4x256xf32> to vector<4x256xf32>
    %c16_i32_11 = arith.constant 16 : i32
    %29 = tpu.dynamic_rotate %28 by %c16_i32_11 dim 1 : vector<4x256xf32>, i32 -> vector<4x256xf32>
    %c240_i32_12 = arith.constant 240 : i32
    %30 = tpu.dynamic_rotate %28 by %c240_i32_12 dim 1 : vector<4x256xf32>, i32 -> vector<4x256xf32>
    %31 = arith.select %18, %30, %29 : vector<4x256xi1>, vector<4x256xf32>
    %32 = arith.select %20, %29, %30 : vector<4x256xi1>, vector<4x256xf32>
    %c1_i32_13 = arith.constant 1 : i32
    %33 = tpu.dynamic_rotate %31 by %c1_i32_13 dim 1 : vector<4x256xf32>, i32 -> vector<4x256xf32>
    %c255_i32 = arith.constant 255 : i32
    %34 = tpu.dynamic_rotate %31 by %c255_i32 dim 1 : vector<4x256xf32>, i32 -> vector<4x256xf32>
    %35 = arith.select %22, %34, %33 : vector<4x256xi1>, vector<4x256xf32>
    %36 = arith.select %24, %33, %34 : vector<4x256xi1>, vector<4x256xf32>
    %c1_i32_14 = arith.constant 1 : i32
    %37 = tpu.dynamic_rotate %28 by %c1_i32_14 dim 1 : vector<4x256xf32>, i32 -> vector<4x256xf32>
    %c255_i32_15 = arith.constant 255 : i32
    %38 = tpu.dynamic_rotate %28 by %c255_i32_15 dim 1 : vector<4x256xf32>, i32 -> vector<4x256xf32>
    %39 = arith.select %22, %38, %37 : vector<4x256xi1>, vector<4x256xf32>
    %40 = arith.select %24, %37, %38 : vector<4x256xi1>, vector<4x256xf32>
    %c1_i32_16 = arith.constant 1 : i32
    %41 = tpu.dynamic_rotate %32 by %c1_i32_16 dim 1 : vector<4x256xf32>, i32 -> vector<4x256xf32>
    %c255_i32_17 = arith.constant 255 : i32
    %42 = tpu.dynamic_rotate %32 by %c255_i32_17 dim 1 : vector<4x256xf32>, i32 -> vector<4x256xf32>
    %43 = arith.select %22, %42, %41 : vector<4x256xi1>, vector<4x256xf32>
    %44 = arith.select %24, %41, %42 : vector<4x256xi1>, vector<4x256xf32>
    %45 = tpu.concatenate %35, %31, %36, %39, %28, %40, %43, %32, %44 in 0 : vector<4x256xf32>, vector<4x256xf32>, vector<4x256xf32>, vector<4x256xf32>, vector<4x256xf32>, vector<4x256xf32>, vector<4x256xf32>, vector<4x256xf32>, vector<4x256xf32> -> vector<36x256xf32>
    %46 = arith.truncf %45 : vector<36x256xf32> to vector<36x256xbf16>
    %cst = arith.constant dense<0.000000e+00> : vector<4x256xf32>
    %47 = tpu.matmul %25, %46, %cst {dimension_numbers = #tpu.dot_dimension_numbers<[1], [0], [0], [1], [0, 0, 1, 1], [], []>} : vector<4x36xbf16>, vector<36x256xbf16>, vector<4x256xf32> -> vector<4x256xf32>
    %cst_18 = arith.constant dense<0.000000e+00> : vector<4xf32>
    %48 = vector.multi_reduction <add>, %47, %cst_18 [1] : vector<4x256xf32> to vector<4xf32>
    %49 = vector.shape_cast %48 : vector<4xf32> to vector<4x1xf32>
    %cst_19 = arith.constant 3.906250e-03 : f32
    %50 = vector.broadcast %cst_19 : f32 to vector<4x1xf32>
    %51 = arith.mulf %49, %50 : vector<4x1xf32>
    %52 = arith.mulf %47, %47 : vector<4x256xf32>
    %cst_20 = arith.constant dense<0.000000e+00> : vector<4xf32>
    %53 = vector.multi_reduction <add>, %52, %cst_20 [1] : vector<4x256xf32> to vector<4xf32>
    %54 = vector.shape_cast %53 : vector<4xf32> to vector<4x1xf32>
    %cst_21 = arith.constant 3.906250e-03 : f32
    %55 = vector.broadcast %cst_21 : f32 to vector<4x1xf32>
    %56 = arith.mulf %54, %55 : vector<4x1xf32>
    %57 = arith.mulf %51, %51 : vector<4x1xf32>
    %58 = arith.subf %56, %57 : vector<4x1xf32>
    %cst_22 = arith.constant 9.99999974E-6 : f32
    %59 = vector.broadcast %cst_22 : f32 to vector<4x1xf32>
    %60 = arith.addf %58, %59 : vector<4x1xf32>
    %61 = math.rsqrt %60 : vector<4x1xf32>
    %62 = vector.broadcast %61 : vector<4x1xf32> to vector<4x256xf32>
    %63 = arith.mulf %47, %62 : vector<4x256xf32>
    %64 = arith.mulf %51, %61 : vector<4x1xf32>
    %65 = vector.broadcast %64 : vector<4x1xf32> to vector<4x256xf32>
    %66 = arith.subf %63, %65 : vector<4x256xf32>
    %cst_23 = arith.constant 0.000000e+00 : f32
    %67 = vector.broadcast %cst_23 : f32 to vector<4x256xf32>
    %68 = arith.maximumf %66, %67 : vector<4x256xf32>
    %c16_i32_24 = arith.constant 16 : i32
    %69 = tpu.dynamic_rotate %68 by %c16_i32_24 dim 1 : vector<4x256xf32>, i32 -> vector<4x256xf32>
    %c240_i32_25 = arith.constant 240 : i32
    %70 = tpu.dynamic_rotate %68 by %c240_i32_25 dim 1 : vector<4x256xf32>, i32 -> vector<4x256xf32>
    %71 = arith.select %18, %70, %69 : vector<4x256xi1>, vector<4x256xf32>
    %72 = arith.select %20, %69, %70 : vector<4x256xi1>, vector<4x256xf32>
    %c1_i32_26 = arith.constant 1 : i32
    %73 = tpu.dynamic_rotate %71 by %c1_i32_26 dim 1 : vector<4x256xf32>, i32 -> vector<4x256xf32>
    %c255_i32_27 = arith.constant 255 : i32
    %74 = tpu.dynamic_rotate %71 by %c255_i32_27 dim 1 : vector<4x256xf32>, i32 -> vector<4x256xf32>
    %75 = arith.select %22, %74, %73 : vector<4x256xi1>, vector<4x256xf32>
    %76 = arith.select %24, %73, %74 : vector<4x256xi1>, vector<4x256xf32>
    %c1_i32_28 = arith.constant 1 : i32
    %77 = tpu.dynamic_rotate %68 by %c1_i32_28 dim 1 : vector<4x256xf32>, i32 -> vector<4x256xf32>
    %c255_i32_29 = arith.constant 255 : i32
    %78 = tpu.dynamic_rotate %68 by %c255_i32_29 dim 1 : vector<4x256xf32>, i32 -> vector<4x256xf32>
    %79 = arith.select %22, %78, %77 : vector<4x256xi1>, vector<4x256xf32>
    %80 = arith.select %24, %77, %78 : vector<4x256xi1>, vector<4x256xf32>
    %c1_i32_30 = arith.constant 1 : i32
    %81 = tpu.dynamic_rotate %72 by %c1_i32_30 dim 1 : vector<4x256xf32>, i32 -> vector<4x256xf32>
    %c255_i32_31 = arith.constant 255 : i32
    %82 = tpu.dynamic_rotate %72 by %c255_i32_31 dim 1 : vector<4x256xf32>, i32 -> vector<4x256xf32>
    %83 = arith.select %22, %82, %81 : vector<4x256xi1>, vector<4x256xf32>
    %84 = arith.select %24, %81, %82 : vector<4x256xi1>, vector<4x256xf32>
    %85 = tpu.concatenate %75, %71, %76, %79, %68, %80, %83, %72, %84 in 0 : vector<4x256xf32>, vector<4x256xf32>, vector<4x256xf32>, vector<4x256xf32>, vector<4x256xf32>, vector<4x256xf32>, vector<4x256xf32>, vector<4x256xf32>, vector<4x256xf32> -> vector<36x256xf32>
    %86 = arith.truncf %85 : vector<36x256xf32> to vector<36x256xbf16>
    %cst_32 = arith.constant dense<0.000000e+00> : vector<4x256xf32>
    %87 = tpu.matmul %26, %86, %cst_32 {dimension_numbers = #tpu.dot_dimension_numbers<[1], [0], [0], [1], [0, 0, 1, 1], [], []>} : vector<4x36xbf16>, vector<36x256xbf16>, vector<4x256xf32> -> vector<4x256xf32>
    %cst_33 = arith.constant dense<0.000000e+00> : vector<4xf32>
    %88 = vector.multi_reduction <add>, %87, %cst_33 [1] : vector<4x256xf32> to vector<4xf32>
    %89 = vector.shape_cast %88 : vector<4xf32> to vector<4x1xf32>
    %cst_34 = arith.constant 3.906250e-03 : f32
    %90 = vector.broadcast %cst_34 : f32 to vector<4x1xf32>
    %91 = arith.mulf %89, %90 : vector<4x1xf32>
    %92 = arith.mulf %87, %87 : vector<4x256xf32>
    %cst_35 = arith.constant dense<0.000000e+00> : vector<4xf32>
    %93 = vector.multi_reduction <add>, %92, %cst_35 [1] : vector<4x256xf32> to vector<4xf32>
    %94 = vector.shape_cast %93 : vector<4xf32> to vector<4x1xf32>
    %cst_36 = arith.constant 3.906250e-03 : f32
    %95 = vector.broadcast %cst_36 : f32 to vector<4x1xf32>
    %96 = arith.mulf %94, %95 : vector<4x1xf32>
    %97 = arith.mulf %91, %91 : vector<4x1xf32>
    %98 = arith.subf %96, %97 : vector<4x1xf32>
    %cst_37 = arith.constant 9.99999974E-6 : f32
    %99 = vector.broadcast %cst_37 : f32 to vector<4x1xf32>
    %100 = arith.addf %98, %99 : vector<4x1xf32>
    %101 = math.rsqrt %100 : vector<4x1xf32>
    %102 = vector.broadcast %101 : vector<4x1xf32> to vector<4x256xf32>
    %103 = arith.mulf %87, %102 : vector<4x256xf32>
    %104 = arith.mulf %91, %101 : vector<4x1xf32>
    %105 = vector.broadcast %104 : vector<4x1xf32> to vector<4x256xf32>
    %106 = arith.subf %103, %105 : vector<4x256xf32>
    %107 = arith.addf %28, %106 : vector<4x256xf32>
    %c0_38 = arith.constant 0 : index
    %c0_39 = arith.constant 0 : index
    %c0_40 = arith.constant 0 : index
    %108 = vector.load %arg4[%c0_38, %c0_39, %c0_40] : memref<2x4x256xf32, #tpu.memory_space<vmem>>, vector<1x4x256xf32>
    %109 = vector.shape_cast %108 : vector<1x4x256xf32> to vector<4x256xf32>
    %110 = vector.shape_cast %107 : vector<4x256xf32> to vector<1x4x256xf32>
    tpu.vector_store %arg4[%c0_38, %c0_39, %c0_40], %110 {strides = array<i32>} : memref<2x4x256xf32, #tpu.memory_space<vmem>>, vector<1x4x256xf32>,
    %c1 = arith.constant 1 : index
    %c0_41 = arith.constant 0 : index
    %c0_42 = arith.constant 0 : index
    %111 = vector.load %arg1[%c1, %c0_41, %c0_42] : memref<2x4x256xf32, #tpu.memory_space<vmem>>, vector<1x4x256xf32>
    %112 = vector.shape_cast %111 : vector<1x4x256xf32> to vector<4x256xf32>
    %c16_i32_43 = arith.constant 16 : i32
    %113 = tpu.dynamic_rotate %112 by %c16_i32_43 dim 1 : vector<4x256xf32>, i32 -> vector<4x256xf32>
    %c240_i32_44 = arith.constant 240 : i32
    %114 = tpu.dynamic_rotate %112 by %c240_i32_44 dim 1 : vector<4x256xf32>, i32 -> vector<4x256xf32>
    %115 = arith.select %18, %114, %113 : vector<4x256xi1>, vector<4x256xf32>
    %116 = arith.select %20, %113, %114 : vector<4x256xi1>, vector<4x256xf32>
    %c1_i32_45 = arith.constant 1 : i32
    %117 = tpu.dynamic_rotate %115 by %c1_i32_45 dim 1 : vector<4x256xf32>, i32 -> vector<4x256xf32>
    %c255_i32_46 = arith.constant 255 : i32
    %118 = tpu.dynamic_rotate %115 by %c255_i32_46 dim 1 : vector<4x256xf32>, i32 -> vector<4x256xf32>
    %119 = arith.select %22, %118, %117 : vector<4x256xi1>, vector<4x256xf32>
    %120 = arith.select %24, %117, %118 : vector<4x256xi1>, vector<4x256xf32>
    %c1_i32_47 = arith.constant 1 : i32
    %121 = tpu.dynamic_rotate %112 by %c1_i32_47 dim 1 : vector<4x256xf32>, i32 -> vector<4x256xf32>
    %c255_i32_48 = arith.constant 255 : i32
    %122 = tpu.dynamic_rotate %112 by %c255_i32_48 dim 1 : vector<4x256xf32>, i32 -> vector<4x256xf32>
    %123 = arith.select %22, %122, %121 : vector<4x256xi1>, vector<4x256xf32>
    %124 = arith.select %24, %121, %122 : vector<4x256xi1>, vector<4x256xf32>
    %c1_i32_49 = arith.constant 1 : i32
    %125 = tpu.dynamic_rotate %116 by %c1_i32_49 dim 1 : vector<4x256xf32>, i32 -> vector<4x256xf32>
    %c255_i32_50 = arith.constant 255 : i32
    %126 = tpu.dynamic_rotate %116 by %c255_i32_50 dim 1 : vector<4x256xf32>, i32 -> vector<4x256xf32>
    %127 = arith.select %22, %126, %125 : vector<4x256xi1>, vector<4x256xf32>
    %128 = arith.select %24, %125, %126 : vector<4x256xi1>, vector<4x256xf32>
    %129 = tpu.concatenate %119, %115, %120, %123, %112, %124, %127, %116, %128 in 0 : vector<4x256xf32>, vector<4x256xf32>, vector<4x256xf32>, vector<4x256xf32>, vector<4x256xf32>, vector<4x256xf32>, vector<4x256xf32>, vector<4x256xf32>, vector<4x256xf32> -> vector<36x256xf32>
    %130 = arith.truncf %129 : vector<36x256xf32> to vector<36x256xbf16>
    %cst_51 = arith.constant dense<0.000000e+00> : vector<4x256xf32>
    %131 = tpu.matmul %25, %130, %cst_51 {dimension_numbers = #tpu.dot_dimension_numbers<[1], [0], [0], [1], [0, 0, 1, 1], [], []>} : vector<4x36xbf16>, vector<36x256xbf16>, vector<4x256xf32> -> vector<4x256xf32>
    %cst_52 = arith.constant dense<0.000000e+00> : vector<4xf32>
    %132 = vector.multi_reduction <add>, %131, %cst_52 [1] : vector<4x256xf32> to vector<4xf32>
    %133 = vector.shape_cast %132 : vector<4xf32> to vector<4x1xf32>
    %cst_53 = arith.constant 3.906250e-03 : f32
    %134 = vector.broadcast %cst_53 : f32 to vector<4x1xf32>
    %135 = arith.mulf %133, %134 : vector<4x1xf32>
    %136 = arith.mulf %131, %131 : vector<4x256xf32>
    %cst_54 = arith.constant dense<0.000000e+00> : vector<4xf32>
    %137 = vector.multi_reduction <add>, %136, %cst_54 [1] : vector<4x256xf32> to vector<4xf32>
    %138 = vector.shape_cast %137 : vector<4xf32> to vector<4x1xf32>
    %cst_55 = arith.constant 3.906250e-03 : f32
    %139 = vector.broadcast %cst_55 : f32 to vector<4x1xf32>
    %140 = arith.mulf %138, %139 : vector<4x1xf32>
    %141 = arith.mulf %135, %135 : vector<4x1xf32>
    %142 = arith.subf %140, %141 : vector<4x1xf32>
    %cst_56 = arith.constant 9.99999974E-6 : f32
    %143 = vector.broadcast %cst_56 : f32 to vector<4x1xf32>
    %144 = arith.addf %142, %143 : vector<4x1xf32>
    %145 = math.rsqrt %144 : vector<4x1xf32>
    %146 = vector.broadcast %145 : vector<4x1xf32> to vector<4x256xf32>
    %147 = arith.mulf %131, %146 : vector<4x256xf32>
    %148 = arith.mulf %135, %145 : vector<4x1xf32>
    %149 = vector.broadcast %148 : vector<4x1xf32> to vector<4x256xf32>
    %150 = arith.subf %147, %149 : vector<4x256xf32>
    %cst_57 = arith.constant 0.000000e+00 : f32
    %151 = vector.broadcast %cst_57 : f32 to vector<4x256xf32>
    %152 = arith.maximumf %150, %151 : vector<4x256xf32>
    %c16_i32_58 = arith.constant 16 : i32
    %153 = tpu.dynamic_rotate %152 by %c16_i32_58 dim 1 : vector<4x256xf32>, i32 -> vector<4x256xf32>
    %c240_i32_59 = arith.constant 240 : i32
    %154 = tpu.dynamic_rotate %152 by %c240_i32_59 dim 1 : vector<4x256xf32>, i32 -> vector<4x256xf32>
    %155 = arith.select %18, %154, %153 : vector<4x256xi1>, vector<4x256xf32>
    %156 = arith.select %20, %153, %154 : vector<4x256xi1>, vector<4x256xf32>
    %c1_i32_60 = arith.constant 1 : i32
    %157 = tpu.dynamic_rotate %155 by %c1_i32_60 dim 1 : vector<4x256xf32>, i32 -> vector<4x256xf32>
    %c255_i32_61 = arith.constant 255 : i32
    %158 = tpu.dynamic_rotate %155 by %c255_i32_61 dim 1 : vector<4x256xf32>, i32 -> vector<4x256xf32>
    %159 = arith.select %22, %158, %157 : vector<4x256xi1>, vector<4x256xf32>
    %160 = arith.select %24, %157, %158 : vector<4x256xi1>, vector<4x256xf32>
    %c1_i32_62 = arith.constant 1 : i32
    %161 = tpu.dynamic_rotate %152 by %c1_i32_62 dim 1 : vector<4x256xf32>, i32 -> vector<4x256xf32>
    %c255_i32_63 = arith.constant 255 : i32
    %162 = tpu.dynamic_rotate %152 by %c255_i32_63 dim 1 : vector<4x256xf32>, i32 -> vector<4x256xf32>
    %163 = arith.select %22, %162, %161 : vector<4x256xi1>, vector<4x256xf32>
    %164 = arith.select %24, %161, %162 : vector<4x256xi1>, vector<4x256xf32>
    %c1_i32_64 = arith.constant 1 : i32
    %165 = tpu.dynamic_rotate %156 by %c1_i32_64 dim 1 : vector<4x256xf32>, i32 -> vector<4x256xf32>
    %c255_i32_65 = arith.constant 255 : i32
    %166 = tpu.dynamic_rotate %156 by %c255_i32_65 dim 1 : vector<4x256xf32>, i32 -> vector<4x256xf32>
    %167 = arith.select %22, %166, %165 : vector<4x256xi1>, vector<4x256xf32>
    %168 = arith.select %24, %165, %166 : vector<4x256xi1>, vector<4x256xf32>
    %169 = tpu.concatenate %159, %155, %160, %163, %152, %164, %167, %156, %168 in 0 : vector<4x256xf32>, vector<4x256xf32>, vector<4x256xf32>, vector<4x256xf32>, vector<4x256xf32>, vector<4x256xf32>, vector<4x256xf32>, vector<4x256xf32>, vector<4x256xf32> -> vector<36x256xf32>
    %170 = arith.truncf %169 : vector<36x256xf32> to vector<36x256xbf16>
    %cst_66 = arith.constant dense<0.000000e+00> : vector<4x256xf32>
    %171 = tpu.matmul %26, %170, %cst_66 {dimension_numbers = #tpu.dot_dimension_numbers<[1], [0], [0], [1], [0, 0, 1, 1], [], []>} : vector<4x36xbf16>, vector<36x256xbf16>, vector<4x256xf32> -> vector<4x256xf32>
    %cst_67 = arith.constant dense<0.000000e+00> : vector<4xf32>
    %172 = vector.multi_reduction <add>, %171, %cst_67 [1] : vector<4x256xf32> to vector<4xf32>
    %173 = vector.shape_cast %172 : vector<4xf32> to vector<4x1xf32>
    %cst_68 = arith.constant 3.906250e-03 : f32
    %174 = vector.broadcast %cst_68 : f32 to vector<4x1xf32>
    %175 = arith.mulf %173, %174 : vector<4x1xf32>
    %176 = arith.mulf %171, %171 : vector<4x256xf32>
    %cst_69 = arith.constant dense<0.000000e+00> : vector<4xf32>
    %177 = vector.multi_reduction <add>, %176, %cst_69 [1] : vector<4x256xf32> to vector<4xf32>
    %178 = vector.shape_cast %177 : vector<4xf32> to vector<4x1xf32>
    %cst_70 = arith.constant 3.906250e-03 : f32
    %179 = vector.broadcast %cst_70 : f32 to vector<4x1xf32>
    %180 = arith.mulf %178, %179 : vector<4x1xf32>
    %181 = arith.mulf %175, %175 : vector<4x1xf32>
    %182 = arith.subf %180, %181 : vector<4x1xf32>
    %cst_71 = arith.constant 9.99999974E-6 : f32
    %183 = vector.broadcast %cst_71 : f32 to vector<4x1xf32>
    %184 = arith.addf %182, %183 : vector<4x1xf32>
    %185 = math.rsqrt %184 : vector<4x1xf32>
    %186 = vector.broadcast %185 : vector<4x1xf32> to vector<4x256xf32>
    %187 = arith.mulf %171, %186 : vector<4x256xf32>
    %188 = arith.mulf %175, %185 : vector<4x1xf32>
    %189 = vector.broadcast %188 : vector<4x1xf32> to vector<4x256xf32>
    %190 = arith.subf %187, %189 : vector<4x256xf32>
    %191 = arith.addf %112, %190 : vector<4x256xf32>
    %c1_72 = arith.constant 1 : index
    %c0_73 = arith.constant 0 : index
    %c0_74 = arith.constant 0 : index
    %192 = vector.load %arg4[%c1_72, %c0_73, %c0_74] : memref<2x4x256xf32, #tpu.memory_space<vmem>>, vector<1x4x256xf32>
    %193 = vector.shape_cast %192 : vector<1x4x256xf32> to vector<4x256xf32>
    %194 = vector.shape_cast %191 : vector<4x256xf32> to vector<1x4x256xf32>
    tpu.vector_store %arg4[%c1_72, %c0_73, %c0_74], %194 {strides = array<i32>} : memref<2x4x256xf32, #tpu.memory_space<vmem>>, vector<1x4x256xf32>,
    return
  }
  func.func @transform_0(%arg0: i32) -> (i32, i32, i32) {
    %c0_i32 = arith.constant 0 : i32
    %c0_i32_0 = arith.constant 0 : i32
    %c0_i32_1 = arith.constant 0 : i32
    return %arg0, %c0_i32, %c0_i32_0 : i32, i32, i32
  }
  func.func @transform_1(%arg0: i32) -> (i32, i32) {
    %c0_i32 = arith.constant 0 : i32
    %c0_i32_0 = arith.constant 0 : i32
    %c0_i32_1 = arith.constant 0 : i32
    return %c0_i32, %c0_i32_0 : i32, i32
  }
  func.func @transform_2(%arg0: i32) -> (i32, i32) {
    %c0_i32 = arith.constant 0 : i32
    %c0_i32_0 = arith.constant 0 : i32
    %c0_i32_1 = arith.constant 0 : i32
    return %c0_i32, %c0_i32_0 : i32, i32
  }
  func.func @transform_3(%arg0: i32) -> (i32, i32, i32) {
    %c0_i32 = arith.constant 0 : i32
    %c0_i32_0 = arith.constant 0 : i32
    %c0_i32_1 = arith.constant 0 : i32
    return %arg0, %c0_i32, %c0_i32_0 : i32, i32, i32
  }
}

</mosaic_0001>

<bundles_post_ra>
// kernel: residual_block_forward.1
= control target key start
LH: loop header
LB: loop body
LE: loop exit
PB: predicated region body
PF: predicated region fallthrough
CT: control target
= control target key end

     0   :  { %s988_s14 = smov 16   ;;  %s989_s15 = smov 112   ;;  %v15_v22 = vlaneseq  ;;  %vm189_vm9 = vcmask 1041408   ;;  %vm170_vm10 = vcmask 1043456   ;;  %vm185_vm11 = vcmask 293888   ;;  %s1518_s0 = inlined_call_operand.vmem [shape: f32[2,4,256], index: 0, kind: input, shape index: {}]   ;;  %s1519_s1 = inlined_call_operand.vmem [shape: bf16[4,36], index: 1, kind: input, shape index: {}]   ;;  %s1520_s2 = inlined_call_operand.vmem [shape: bf16[4,36], index: 2, kind: input, shape index: {}]   ;;  %s1521_s3 = inlined_call_operand.vmem [shape: f32[2,4,256], index: 3, kind: output, shape index: {}]  }
   0x1   :  { %v1015_v0 = vld [vmem:[%s1518_s0] sm:$0xff]  ;;  %s990_s16 = smov 1   ;;  %v1028_v12 = vld [vmem:[%s1518_s0 + $0x8] sm:$0xff]  ;;  %s991_s0 = smov 127  }
   0x2   :  { %54 = vst [vmem:[#allocation1] ss:$2 sm:$0xff] %v1015_v0  ;;  %v1040_v23 = vand.u32 127, %v15_v22 }
   0x4   :  { %v1043_v25 = vadd.s32 128, %v1040_v23  ;;  %vm42_vm0 = vcmp.lt.s32.totalorder %v1040_v23, 16  ;;  %vm74_vm2 = vcmp.lt.s32.totalorder %v1040_v23, 112  ;;  %vm85_vm3 = vcmp.lt.s32.totalorder %v1040_v23, 1 }
   0x5   :  { %vm92_vm4 = vcmp.lt.s32.totalorder %v1040_v23, 127 }
   0x6   :  { %vm45_vm1 = vcmp.ge.s32.totalorder %v1043_v25, 240  ;;  %v29_v61 = vand.u32 15, %v1043_v25 }
   0x8   :  { %vm1116_vm5 = vcmp.eq.s32.totalorder %v29_v61, 15  ;;  %vm1136_vm7 = vcmp.eq.s32.totalorder %v29_v61, 0 }
   0x9   :  { %v55_v1 = vld.sshfl [vmem:[#allocation1] sm:$0xff pattern:$0x75316420]  ;;  %v56_v2 = vld.sshfl [vmem:[#allocation1 + $0x8] sm:$0xff pattern:$0x75316420] }
   0xa   :  { %v820_v3 = vpack.i.bf16 %v56_v2, %v55_v1  ;;  %65 = vst [vmem:[#allocation1] ss:$2 sm:$0xff] %v1015_v0 }
   0xc   :  { %821 = vrot.lane.b32.xlu0 %v820_v3, %s988_s14 }
  0x11   :  { %v66_v4 = vld.sshfl [vmem:[#allocation1] sm:$0xff pattern:$0x75316420]  ;;  %v67_v5 = vld.sshfl [vmem:[#allocation1 + $0x8] sm:$0xff pattern:$0x75316420] }
  0x12   :  { %v825_v6 = vpack.i.bf16 %v67_v5, %v66_v4  ;;  %99 = vst [vmem:[#allocation1] ss:$2 sm:$0xff] %v1015_v0  ;;  %v22_v4 = vand.u32 15, %v1040_v23 }
  0x14   :  { %826 = vrot.lane.b32.xlu0 %v825_v6, %s989_s15  ;;  %vm1128_vm6 = vcmp.eq.s32.totalorder %v22_v4, 15  ;;  %vm1140_vm8 = vcmp.eq.s32.totalorder %v22_v4, 0 }
  0x19   :  { %v100_v7 = vld.sshfl [vmem:[#allocation1] sm:$0xff pattern:$0x75316420]  ;;  %v101_v8 = vld.sshfl [vmem:[#allocation1 + $0x8] sm:$0xff pattern:$0x75316420] }
  0x1a   :  { %110 = vst [vmem:[#allocation1] ss:$2 sm:$0xff] %v1015_v0  ;;  %v840_v9 = vpack.i.bf16 %v101_v8, %v100_v7 }
  0x1c   :  { %841 = vrot.lane.b32.xlu0 %v840_v9, %s990_s16 }
  0x21   :  { %v111_v10 = vld.sshfl [vmem:[#allocation1] sm:$0xff pattern:$0x75316420]  ;;  %v112_v11 = vld.sshfl [vmem:[#allocation1 + $0x8] sm:$0xff pattern:$0x75316420] }
  0x22   :  { %153 = vst [vmem:[#allocation1] ss:$2 sm:$0xff] %v1015_v0  ;;  %v845_v21 = vpack.i.bf16 %v112_v11, %v111_v10 }
  0x29   :  { %v1030_v13 = vld.sshfl [vmem:[#allocation1] sm:$0xff pattern:$0x75316420]  ;;  %v1032_v14 = vld.sshfl [vmem:[#allocation1 + $0x8] sm:$0xff pattern:$0x75316420] }
  0x2a   :  { %435 = vst [vmem:[#allocation1] ss:$2 sm:$0xff] %v1028_v12 }
  0x31   :  { %v436_v15 = vld.sshfl [vmem:[#allocation1] sm:$0xff pattern:$0x75316420]  ;;  %v437_v16 = vld.sshfl [vmem:[#allocation1 + $0x8] sm:$0xff pattern:$0x75316420] }
  0x32   :  { %v830_v17 = vpack.i.bf16 %v437_v16, %v436_v15  ;;  %446 = vst [vmem:[#allocation1] ss:$2 sm:$0xff] %v1028_v12 }
  0x34   :  { %831 = vrot.lane.b32.xlu1 %v830_v17, %s988_s14 }
  0x39   :  { %v447_v18 = vld.sshfl [vmem:[#allocation1] sm:$0xff pattern:$0x75316420]  ;;  %v448_v19 = vld.sshfl [vmem:[#allocation1 + $0x8] sm:$0xff pattern:$0x75316420] }
  0x3a   :  { %v835_v20 = vpack.i.bf16 %v448_v19, %v447_v18  ;;  %477 = vst [vmem:[#allocation1] ss:$2 sm:$0xff] %v1028_v12 }
  0x3c   :  { %836 = vrot.lane.b32.xlu1 %v835_v20, %s989_s15 }
  0x41   :  { %v478_v35 = vld.sshfl [vmem:[#allocation1] sm:$0xff pattern:$0x75316420]  ;;  %v479_v36 = vld.sshfl [vmem:[#allocation1 + $0x8] sm:$0xff pattern:$0x75316420] }
  0x42   :  { %488 = vst [vmem:[#allocation1] ss:$2 sm:$0xff] %v1028_v12  ;;  %v870_v41 = vpack.i.bf16 %v479_v36, %v478_v35 }
  0x44   :  { %846 = vrot.lane.b32.xlu1 %v845_v21, %s991_s0 }
  0x49   :  { %v489_v42 = vld.sshfl [vmem:[#allocation1] sm:$0xff pattern:$0x75316420]  ;;  %v490_v43 = vld.sshfl [vmem:[#allocation1 + $0x8] sm:$0xff pattern:$0x75316420] }
  0x4a   :  { %531 = vst [vmem:[#allocation1] ss:$2 sm:$0xff] %v1028_v12  ;;  %v880_v58 = vpack.i.bf16 %v490_v43, %v489_v42 }
  0x7e   :  { %v822_v24 = vpop.permute.xlu0 %821 }
  0x7f   :  { %v824_v26 = vunpack.i.h.bf16 %v822_v24  ;;  %v823_v27 = vunpack.i.l.bf16 %v822_v24 }
  0x81   :  { %v1050_v29 = vsel %vm42_vm0, %v823_v27, %v824_v26  ;;  %v64_v30 = vsel %vm42_vm0, %v824_v26, %v823_v27 }
  0x86   :  { %v827_v28 = vpop.permute.xlu0 %826 }
  0x87   :  { %v829_v31 = vunpack.i.h.bf16 %v827_v28  ;;  %v828_v32 = vunpack.i.l.bf16 %v827_v28 }
  0x89   :  { %v1056_v33 = vsel %vm74_vm2, %v828_v32, %v829_v31  ;;  %v76_v34 = vsel %vm74_vm2, %v829_v31, %v828_v32 }
  0x8a   :  { %v1063_v37 = vsel %vm45_vm1, %v1050_v29, %v76_v34  ;;  %v1068_v38 = vsel %vm42_vm0, %v1056_v33, %v64_v30  ;;  %v166_v42 = vrot.slane %v1056_v33, 4 }
  0x8b   :  { %v850_v39 = vpack.i.bf16 %v1063_v37, %v1056_v33  ;;  %v865_v40 = vpack.i.bf16 %v1050_v29, %v1068_v38 }
  0x8d   :  { %851 = vrot.lane.b32.xlu2 %v850_v39, %s990_s16  ;;  %866 = vrot.lane.b32.xlu0 %v865_v40, %s991_s0 }
  0x8e   :  { %v842_v59 = vpop.permute.xlu0 %841 }
  0x8f   :  { %v844_v62 = vunpack.i.h.bf16 %v842_v59  ;;  %v843_v63 = vunpack.i.l.bf16 %v842_v59 }
  0x91   :  { %v108_v6 = vsel %vm85_vm3, %v843_v63, %v844_v62  ;;  %v109_v7 = vsel %vm85_vm3, %v844_v62, %v843_v63 }
  0x95   :  { %856 = vrot.lane.b32.xlu2 %v850_v39, %s991_s0  ;;  %871 = vrot.lane.b32.xlu0 %v870_v41, %s990_s16  ;;  %v167_v39 = vrot.slane %v1063_v37, 4 }
  0x9d   :  { %861 = vrot.lane.b32.xlu2 %v865_v40, %s990_s16 }
  0xa6   :  { %v832_v44 = vpop.permute.xlu1 %831 }
  0xa7   :  { %v834_v45 = vunpack.i.h.bf16 %v832_v44  ;;  %v833_v46 = vunpack.i.l.bf16 %v832_v44 }
  0xa9   :  { %v1083_v50 = vsel %vm42_vm0, %v833_v46, %v834_v45  ;;  %v445_v51 = vsel %vm42_vm0, %v834_v45, %v833_v46 }
  0xae   :  { %v837_v47 = vpop.permute.xlu1 %836 }
  0xaf   :  { %v839_v48 = vunpack.i.h.bf16 %v837_v47  ;;  %v838_v49 = vunpack.i.l.bf16 %v837_v47 }
  0xb1   :  { %v1089_v52 = vsel %vm74_vm2, %v838_v49, %v839_v48  ;;  %v456_v53 = vsel %vm74_vm2, %v839_v48, %v838_v49 }
  0xb2   :  { %v1096_v54 = vsel %vm45_vm1, %v1083_v50, %v456_v53  ;;  %v1101_v55 = vsel %vm42_vm0, %v1089_v52, %v445_v51 }
  0xb3   :  { %v885_v56 = vpack.i.bf16 %v1096_v54, %v1089_v52  ;;  %v895_v57 = vpack.i.bf16 %v1083_v50, %v1101_v55 }
  0xb5   :  { %886 = vrot.lane.b32.xlu2 %v885_v56, %s991_s0  ;;  %876 = vrot.lane.b32.xlu1 %v885_v56, %s990_s16 }
  0xb6   :  { %896 = vrot.lane.b32.xlu0 %v895_v57, %s991_s0  ;;  %v847_v60 = vpop.permute.xlu1 %846 }
  0xb7   :  { %v849_v2 = vunpack.i.h.bf16 %v847_v60  ;;  %v848_v3 = vunpack.i.l.bf16 %v847_v60 }
  0xb9   :  { %v119_v8 = vsel %vm92_vm4, %v848_v3, %v849_v2  ;;  %v120_v9 = vsel %vm92_vm4, %v849_v2, %v848_v3  ;;  %v143_v2 = vrot.slane %v1068_v38, 4  ;;  %v144_v3 = vrot.slane %v1050_v29, 4 }
  0xba   :  { %v123_v16 = vsel %vm1128_vm6, %v109_v7, %v119_v8  ;;  %v124_v17 = vsel %vm1116_vm5, %v108_v6, %v120_v9  ;;  %v122_v53 = vsel %vm1136_vm7, %v120_v9, %v108_v6 }
  0xbb   :  { %v160_v27 = vrot.slane %v123_v16, 4  ;;  %v161_v28 = vrot.slane %v124_v17, 4  ;;  %v1199_v17 = vld [vmem:[%s1519_s1] sm:$0x3] }
  0xbd   :  { %891 = vrot.lane.b32.xlu2 %v895_v57, %s990_s16  ;;  %881 = vrot.lane.b32.xlu1 %v880_v58, %s991_s0  ;;  %v175_v43 = vsel %vm170_vm10, %v1030_v13, %v160_v27  ;;  %v176_v44 = vsel %vm170_vm10, %v1032_v14, %v161_v28  ;;  %v121_v14 = vsel %vm1140_vm8, %v119_v8, %v109_v7  ;;  %v150_v58 = vrot.slane %v122_v53, 4 }
  0xbe   :  { %v149_v57 = vrot.slane %v121_v14, 4 }
  0xe7   :  { %v852_v1 = vpop.permute.xlu2 %851 }
  0xe8   :  { %v854_v11 = vunpack.i.h.bf16 %v852_v1  ;;  %v853_v15 = vunpack.i.l.bf16 %v852_v1 }
  0xea   :  { %v130_v24 = vsel %vm85_vm3, %v854_v11, %v853_v15  ;;  %v129_v26 = vsel %vm85_vm3, %v853_v15, %v854_v11 }
  0xef   :  { %v857_v19 = vpop.permute.xlu2 %856 }
  0xf0   :  { %v859_v21 = vunpack.i.h.bf16 %v857_v19  ;;  %v858_v22 = vunpack.i.l.bf16 %v857_v19 }
  0xf2   :  { %v135_v30 = vsel %vm92_vm4, %v858_v22, %v859_v21  ;;  %v136_v31 = vsel %vm92_vm4, %v859_v21, %v858_v22 }
  0xf3   :  { %v139_v32 = vsel %vm1128_vm6, %v130_v24, %v135_v30  ;;  %v140_v34 = vsel %vm1116_vm5, %v129_v26, %v136_v31  ;;  %v137_v35 = vsel %vm1140_vm8, %v135_v30, %v130_v24  ;;  %v138_v36 = vsel %vm1136_vm7, %v136_v31, %v129_v26 }
  0xf4   :  { %v183_v40 = vpack.c.bf16 %v139_v32, %v139_v32  ;;  %v184_v41 = vpack.c.bf16 %v140_v34, %v140_v34  ;;  %v177_v47 = vsel %vm170_vm10, %v137_v35, %v166_v42  ;;  %v178_v48 = vsel %vm170_vm10, %v138_v36, %v167_v39 }
  0xf5   :  { %v181_v37 = vpack.c.bf16 %v177_v47, %v175_v43  ;;  %v182_v49 = vpack.c.bf16 %v178_v48, %v176_v44 }
  0xf6   :  { %v191_v45 = vsel %vm189_vm9, %v183_v40, 0  ;;  %v194_v46 = vsel %vm189_vm9, %v184_v41, 0 }
  0xf7   :  { %201 = vmatpush.bf16.msra.mxu0 %v191_v45  ;;  %214 = vmatpush.bf16.msra.mxu1 %v194_v46  ;;  %v862_v51 = vpop.permute.xlu2 %861 }
  0xf8   :  { %v864_v33 = vunpack.i.h.bf16 %v862_v51  ;;  %v863_v13 = vunpack.i.l.bf16 %v862_v51  ;;  %v545_v51 = vrot.slane %v1096_v54, 4 }
  0xfa   :  { %v86_v59 = vsel %vm85_vm3, %v863_v13, %v864_v33  ;;  %v87_v60 = vsel %vm85_vm3, %v864_v33, %v863_v13 }
  0xfb   :  { %202 = vmatpush.bf16.msra.mxu0 %v181_v37  ;;  %215 = vmatpush.bf16.msra.mxu1 %v182_v49  ;;  %v544_v49 = vrot.slane %v1089_v52, 4 }
  0xff   :  { %v867_v56 = vpop.permute.xlu0 %866 }
 0x100   :  { %v869_v61 = vunpack.i.h.bf16 %v867_v56  ;;  %v868_v62 = vunpack.i.l.bf16 %v867_v56 }
 0x102   :  { %v93_v63 = vsel %vm92_vm4, %v868_v62, %v869_v61  ;;  %v94_v1 = vsel %vm92_vm4, %v869_v61, %v868_v62 }
 0x103   :  { %v95_v4 = vsel %vm1140_vm8, %v93_v63, %v87_v60  ;;  %v97_v6 = vsel %vm1128_vm6, %v87_v60, %v93_v63  ;;  %v96_v7 = vsel %vm1136_vm7, %v94_v1, %v86_v59  ;;  %v98_v8 = vsel %vm1116_vm5, %v86_v59, %v94_v1  ;;  %v532_v63 = vld.sshfl [vmem:[#allocation1] sm:$0xff pattern:$0x75316420] }
 0x104   :  { %v171_v9 = vsel %vm170_vm10, %v95_v4, %v143_v2  ;;  %v173_v11 = vsel %vm170_vm10, %v97_v6, %v149_v57  ;;  %v172_v38 = vsel %vm170_vm10, %v96_v7, %v144_v3  ;;  %v174_v29 = vsel %vm170_vm10, %v98_v8, %v150_v58  ;;  %v533_v2 = vld.sshfl [vmem:[#allocation1 + $0x8] sm:$0xff pattern:$0x75316420] }
 0x105   :  { %v179_v15 = vpack.c.bf16 %v173_v11, %v171_v9  ;;  %v180_v16 = vpack.c.bf16 %v174_v29, %v172_v38 }
 0x107   :  { %203 = vmatpush.bf16.msra.mxu0 %v179_v15  ;;  %216 = vmatpush.bf16.msra.mxu1 %v180_v16  ;;  %v872_v19 = vpop.permute.xlu0 %871 }
 0x108   :  { %v874_v40 = vunpack.i.h.bf16 %v872_v19  ;;  %v873_v41 = vunpack.i.l.bf16 %v872_v19 }
 0x10a   :  { %806 = vmatmul.msk.bf16.vlgmr.msra.gmra.mxu0 %vm185_vm11, %v1199_v17  ;;  %807 = vmatmul.msk.bf16.vlgmr.msra.gmra.mxu1 %vm185_vm11, %v1199_v17  ;;  %v486_v33 = vsel %vm85_vm3, %v873_v41, %v874_v40  ;;  %v487_v13 = vsel %vm85_vm3, %v874_v40, %v873_v41 }
 0x10f   :  { %v887_v21 = vpop.permute.xlu2 %886 }
 0x110   :  { %v889_v22 = vunpack.i.h.bf16 %v887_v21  ;;  %v888_v24 = vunpack.i.l.bf16 %v887_v21 }
 0x112   :  { %v513_v32 = vsel %vm92_vm4, %v888_v24, %v889_v22  ;;  %v514_v35 = vsel %vm92_vm4, %v889_v22, %v888_v24 }
 0x117   :  { %v892_v46 = vpop.permute.xlu2 %891 }
 0x118   :  { %v894_v56 = vunpack.i.h.bf16 %v892_v46  ;;  %v893_v57 = vunpack.i.l.bf16 %v892_v46 }
 0x11a   :  { %v465_v11 = vsel %vm85_vm3, %v893_v57, %v894_v56  ;;  %v466_v38 = vsel %vm85_vm3, %v894_v56, %v893_v57 }
 0x127   :  { %v877_v26 = vpop.permute.xlu1 %876 }
 0x128   :  { %v879_v27 = vunpack.i.h.bf16 %v877_v26  ;;  %v878_v28 = vunpack.i.l.bf16 %v877_v26  ;;  %v897_v30 = vpop.permute.xlu0 %896 }
 0x129   :  { %v899_v44 = vunpack.i.h.bf16 %v897_v30  ;;  %v898_v45 = vunpack.i.l.bf16 %v897_v30  ;;  %v521_v30 = vrot.slane %v1101_v55, 4 }
 0x12a   :  { %v508_v31 = vsel %vm85_vm3, %v879_v27, %v878_v28  ;;  %v507_v34 = vsel %vm85_vm3, %v878_v28, %v879_v27 }
 0x12b   :  { %v517_v36 = vsel %vm1128_vm6, %v508_v31, %v513_v32  ;;  %v518_v39 = vsel %vm1116_vm5, %v507_v34, %v514_v35  ;;  %v471_v58 = vsel %vm92_vm4, %v898_v45, %v899_v44  ;;  %v472_v59 = vsel %vm92_vm4, %v899_v44, %v898_v45 }
 0x12c   :  { %v560_v42 = vpack.c.bf16 %v517_v36, %v517_v36  ;;  %v561_v43 = vpack.c.bf16 %v518_v39, %v518_v39  ;;  %v515_v60 = vsel %vm1140_vm8, %v513_v32, %v508_v31  ;;  %v516_v61 = vsel %vm1136_vm7, %v514_v35, %v507_v34 }
 0x12d   :  { %v554_v29 = vsel %vm170_vm10, %v515_v60, %v544_v49  ;;  %v555_v15 = vsel %vm170_vm10, %v516_v61, %v545_v51  ;;  %v473_v21 = vsel %vm1140_vm8, %v471_v58, %v466_v38  ;;  %v475_v22 = vsel %vm1128_vm6, %v466_v38, %v471_v58 }
 0x12e   :  { %v563_v47 = vsel %vm189_vm9, %v560_v42, 0  ;;  %v566_v48 = vsel %vm189_vm9, %v561_v43, 0  ;;  %v474_v27 = vsel %vm1136_vm7, %v472_v59, %v465_v11  ;;  %v476_v28 = vsel %vm1116_vm5, %v465_v11, %v472_v59 }
 0x12f   :  { %573 = vmatpush.bf16.msrb.mxu0 %v563_v47  ;;  %586 = vmatpush.bf16.msrb.mxu1 %v566_v48  ;;  %v882_v37 = vpop.permute.xlu1 %881  ;;  %v522_v32 = vrot.slane %v1083_v50, 4  ;;  %v548_v35 = vsel %vm170_vm10, %v473_v21, %v521_v30 }
 0x130   :  { %v884_v14 = vunpack.i.h.bf16 %v882_v37  ;;  %v883_v53 = vunpack.i.l.bf16 %v882_v37 }
 0x131   :  { %v549_v36 = vsel %vm170_vm10, %v474_v27, %v522_v32 }
 0x132   :  { %v497_v52 = vsel %vm92_vm4, %v883_v53, %v884_v14  ;;  %v498_v54 = vsel %vm92_vm4, %v884_v14, %v883_v53 }
 0x133   :  { %v501_v62 = vsel %vm1128_vm6, %v487_v13, %v497_v52  ;;  %v502_v1 = vsel %vm1116_vm5, %v486_v33, %v498_v54  ;;  %v499_v3 = vsel %vm1140_vm8, %v497_v52, %v487_v13  ;;  %v500_v4 = vsel %vm1136_vm7, %v498_v54, %v486_v33 }
 0x134   :  { %v538_v6 = vrot.slane %v501_v62, 4  ;;  %v539_v7 = vrot.slane %v502_v1, 4  ;;  %v527_v8 = vrot.slane %v499_v3, 4  ;;  %v528_v9 = vrot.slane %v500_v4, 4 }
 0x136   :  { %v552_v16 = vsel %vm170_vm10, %v532_v63, %v538_v6  ;;  %v553_v19 = vsel %vm170_vm10, %v533_v2, %v539_v7  ;;  %v550_v31 = vsel %vm170_vm10, %v475_v22, %v527_v8  ;;  %v551_v34 = vsel %vm170_vm10, %v476_v28, %v528_v9 }
 0x137   :  { %v558_v24 = vpack.c.bf16 %v554_v29, %v552_v16  ;;  %v559_v26 = vpack.c.bf16 %v555_v15, %v553_v19  ;;  %v556_v39 = vpack.c.bf16 %v550_v31, %v548_v35  ;;  %v557_v40 = vpack.c.bf16 %v551_v34, %v549_v36 }
 0x139   :  { %574 = vmatpush.bf16.msrb.mxu0 %v558_v24  ;;  %587 = vmatpush.bf16.msrb.mxu1 %v559_v26 }
 0x13d   :  { %575 = vmatpush.bf16.msrb.mxu0 %v556_v39  ;;  %588 = vmatpush.bf16.msrb.mxu1 %v557_v40 }
 0x140   :  { %811 = vmatmul.msk.bf16.vlgmr.msrb.gmra.mxu0 %vm185_vm11, %v1199_v17  ;;  %812 = vmatmul.msk.bf16.vlgmr.msrb.gmra.mxu1 %vm185_vm11, %v1199_v17 }
 0x187   :  { %v205_v55 = vpop.f32.mrf.mxu0  ;;  %v218_v50 = vpop.f32.mrf.mxu1 }
 0x188   :  { %v228_v41 = vmul.f32 %v205_v55, %v205_v55  ;;  %v229_v42 = vmul.f32 %v218_v50, %v218_v50  ;;  %v222_v43 = vsel %vm170_vm10, %v205_v55, 0.0  ;;  %v223_v44 = vsel %vm170_vm10, %v218_v50, 0.0 }
 0x189   :  { %v224_v45 = vadd.f32 %v223_v44, %v222_v43 }
 0x18a   :  { %v230_v46 = vsel %vm170_vm10, %v228_v41, 0.0  ;;  %v231_v47 = vsel %vm170_vm10, %v229_v42, 0.0 }
 0x18b   :  { %225 = vadd.xlane.f32.xlu1 %v224_v45  ;;  %v232_v48 = vadd.f32 %v231_v47, %v230_v46 }
 0x18d   :  { %233 = vadd.xlane.f32.xlu2 %v232_v48 }
 0x18f   :  { %v207_v37 = vpop.f32.mrf.mxu0  ;;  %v220_v49 = vpop.f32.mrf.mxu1 }
 0x1bd   :  { %v577_v51 = vpop.f32.mrf.mxu0  ;;  %v590_v17 = vpop.f32.mrf.mxu1 }
 0x1be   :  { %v600_v33 = vmul.f32 %v577_v51, %v577_v51  ;;  %v601_v13 = vmul.f32 %v590_v17, %v590_v17  ;;  %v594_v14 = vsel %vm170_vm10, %v577_v51, 0.0  ;;  %v595_v53 = vsel %vm170_vm10, %v590_v17, 0.0 }
 0x1bf   :  { %v596_v56 = vadd.f32 %v595_v53, %v594_v14 }
 0x1c0   :  { %v602_v57 = vsel %vm170_vm10, %v600_v33, 0.0  ;;  %v603_v58 = vsel %vm170_vm10, %v601_v13, 0.0 }
 0x1c1   :  { %597 = vadd.xlane.f32.xlu0 %v596_v56  ;;  %v604_v59 = vadd.f32 %v603_v58, %v602_v57 }
 0x1c3   :  { %605 = vadd.xlane.f32.xlu2 %v604_v59 }
 0x1c5   :  { %v579_v52 = vpop.f32.mrf.mxu0  ;;  %v592_v54 = vpop.f32.mrf.mxu1 }
 0x1fe   :  { %v226_v60 = vpop.xlane.xlu1 %225 }
 0x1ff   :  { %v227_v61 = vmul.f32 0.00390625, %v226_v60 }
 0x200   :  { %v234_v62 = vpop.xlane.xlu2 %233 }
 0x201   :  { %v236_v63 = vmul.f32 %v227_v61, %v227_v61  ;;  %v235_v1 = vmul.f32 0.00390625, %v234_v62 }
 0x203   :  { %v237_v2 = vsub.f32 %v235_v1, %v236_v63 }
 0x205   :  { %v238_v3 = vadd.f32 1e-05, %v237_v2 }
 0x207   :  { %980 = vrsqrt.f32 %v238_v3  ;;  %vm245_vm12 = vweird.f32 %v238_v3 }
 0x20d   :  { %v981_v4 = vpop.eup %980 }
 0x20e   :  { %v240_v6 = vmul.f32 %v981_v4, %v238_v3  ;;  %vm246_vm13 = vweird.f32 %v981_v4 }
 0x20f   :  { %vm247_vm14 = vmor %vm245_vm12, %vm246_vm13 }
 0x210   :  { %v241_v7 = vmul.f32 %v981_v4, %v240_v6 }
 0x212   :  { %v242_v8 = vmul.f32 0.5, %v241_v7 }
 0x214   :  { %v243_v9 = vsub.f32 1.5, %v242_v8 }
 0x216   :  { %v244_v11 = vmul.f32 %v981_v4, %v243_v9 }
 0x218   :  { %v248_v38 = vsel %vm247_vm14, %v981_v4, %v244_v11 }
 0x219   :  { %v249_v29 = vmul.f32 %v248_v38, %v205_v55  ;;  %v250_v15 = vmul.f32 %v248_v38, %v218_v50  ;;  %v251_v16 = vmul.f32 %v248_v38, %v227_v61 }
 0x21b   :  { %v252_v19 = vsub.f32 %v249_v29, %v251_v16  ;;  %v253_v21 = vsub.f32 %v250_v15, %v251_v16 }
 0x21d   :  { %v1279_v22 = vmax.f32 %v252_v19, 0.0  ;;  %v1281_v24 = vmax.f32 %v253_v21, 0.0 }
 0x21f   :  { %v900_v26 = vpack.i.bf16 %v1281_v24, %v1279_v22 }
 0x221   :  { %901 = vrot.lane.b32.xlu1 %v900_v26, %s988_s14  ;;  %906 = vrot.lane.b32.xlu2 %v900_v26, %s989_s15 }
 0x234   :  { %v598_v27 = vpop.xlane.xlu0 %597 }
 0x235   :  { %v599_v28 = vmul.f32 0.00390625, %v598_v27 }
 0x236   :  { %v606_v30 = vpop.xlane.xlu2 %605 }
 0x237   :  { %v608_v31 = vmul.f32 %v599_v28, %v599_v28  ;;  %v607_v32 = vmul.f32 0.00390625, %v606_v30 }
 0x239   :  { %v609_v34 = vsub.f32 %v607_v32, %v608_v31 }
 0x23b   :  { %v610_v35 = vadd.f32 1e-05, %v609_v34 }
 0x23d   :  { %982 = vrsqrt.f32 %v610_v35  ;;  %vm617_vm12 = vweird.f32 %v610_v35 }
 0x243   :  { %v983_v36 = vpop.eup %982 }
 0x244   :  { %v612_v39 = vmul.f32 %v983_v36, %v610_v35  ;;  %vm618_vm15 = vweird.f32 %v983_v36 }
 0x245   :  { %vm619_vm13 = vmor %vm617_vm12, %vm618_vm15 }
 0x246   :  { %v613_v40 = vmul.f32 %v983_v36, %v612_v39 }
 0x248   :  { %v614_v55 = vmul.f32 0.5, %v613_v40 }
 0x24a   :  { %v615_v50 = vsub.f32 1.5, %v614_v55 }
 0x24c   :  { %v616_v41 = vmul.f32 %v983_v36, %v615_v50 }
 0x24e   :  { %v620_v42 = vsel %vm619_vm13, %v983_v36, %v616_v41 }
 0x24f   :  { %v621_v43 = vmul.f32 %v620_v42, %v577_v51  ;;  %v622_v44 = vmul.f32 %v620_v42, %v590_v17  ;;  %v623_v45 = vmul.f32 %v620_v42, %v599_v28 }
 0x251   :  { %v624_v46 = vsub.f32 %v621_v43, %v623_v45  ;;  %v625_v47 = vsub.f32 %v622_v44, %v623_v45 }
 0x253   :  { %v1287_v48 = vmax.f32 %v624_v46, 0.0  ;;  %v1289_v37 = vmax.f32 %v625_v47, 0.0 }
 0x255   :  { %v915_v49 = vpack.i.bf16 %v1289_v37, %v1287_v48 }
 0x257   :  { %916 = vrot.lane.b32.xlu1 %v915_v49, %s989_s15  ;;  %911 = vrot.lane.b32.xlu0 %v915_v49, %s988_s14 }
 0x25f   :  { %921 = vrot.lane.b32.xlu1 %v900_v26, %s990_s16 }
 0x27b   :  { %v907_v33 = vpop.permute.xlu2 %906 }
 0x27c   :  { %v909_v13 = vunpack.i.h.bf16 %v907_v33  ;;  %v908_v51 = vunpack.i.l.bf16 %v907_v33 }
 0x27e   :  { %v1298_v56 = vsel %vm74_vm2, %v908_v51, %v909_v13  ;;  %v267_v57 = vsel %vm74_vm2, %v909_v13, %v908_v51 }
 0x27f   :  { %v340_v13 = vrot.slane %v1298_v56, 4 }
 0x293   :  { %v902_v17 = vpop.permute.xlu1 %901 }
 0x294   :  { %v904_v14 = vunpack.i.h.bf16 %v902_v17  ;;  %v903_v53 = vunpack.i.l.bf16 %v902_v17 }
 0x296   :  { %v1304_v58 = vsel %vm42_vm0, %v903_v53, %v904_v14  ;;  %v261_v59 = vsel %vm42_vm0, %v904_v14, %v903_v53 }
 0x297   :  { %v1311_v52 = vsel %vm45_vm1, %v1304_v58, %v267_v57  ;;  %v1316_v54 = vsel %vm42_vm0, %v1298_v56, %v261_v59 }
 0x298   :  { %v935_v60 = vpack.i.bf16 %v1311_v52, %v1298_v56  ;;  %v945_v61 = vpack.i.bf16 %v1304_v58, %v1316_v54  ;;  %v341_v53 = vrot.slane %v1311_v52, 4 }
 0x29a   :  { %936 = vrot.lane.b32.xlu2 %v935_v60, %s991_s0  ;;  %946 = vrot.lane.b32.xlu1 %v945_v61, %s991_s0 }
 0x29b   :  { %926 = vrot.lane.b32.xlu0 %v935_v60, %s990_s16 }
 0x2a2   :  { %941 = vrot.lane.b32.xlu2 %v945_v61, %s990_s16  ;;  %951 = vrot.lane.b32.xlu1 %v915_v49, %s990_s16 }
 0x2a3   :  { %931 = vrot.lane.b32.xlu0 %v900_v26, %s991_s0 }
 0x2c9   :  { %v917_v62 = vpop.permute.xlu1 %916  ;;  %v912_v63 = vpop.permute.xlu0 %911 }
 0x2ca   :  { %v919_v1 = vunpack.i.h.bf16 %v917_v62  ;;  %v918_v2 = vunpack.i.l.bf16 %v917_v62  ;;  %v914_v3 = vunpack.i.h.bf16 %v912_v63  ;;  %v913_v4 = vunpack.i.l.bf16 %v912_v63 }
 0x2cc   :  { %v1330_v6 = vsel %vm74_vm2, %v918_v2, %v919_v1  ;;  %v639_v7 = vsel %vm74_vm2, %v919_v1, %v918_v2  ;;  %v1336_v8 = vsel %vm42_vm0, %v913_v4, %v914_v3  ;;  %v633_v9 = vsel %vm42_vm0, %v914_v3, %v913_v4 }
 0x2cd   :  { %v1343_v11 = vsel %vm42_vm0, %v1330_v6, %v633_v9  ;;  %v1348_v38 = vsel %vm45_vm1, %v1336_v8, %v639_v7 }
 0x2ce   :  { %v975_v29 = vpack.i.bf16 %v1336_v8, %v1343_v11  ;;  %v965_v15 = vpack.i.bf16 %v1348_v38, %v1330_v6  ;;  %v694_v10 = vrot.slane %v1343_v11, 4 }
 0x2d0   :  { %976 = vrot.lane.b32.xlu1 %v975_v29, %s991_s0  ;;  %966 = vrot.lane.b32.xlu2 %v965_v15, %s991_s0 }
 0x2d1   :  { %956 = vrot.lane.b32.xlu0 %v965_v15, %s990_s16  ;;  %v922_v25 = vpop.permute.xlu1 %921 }
 0x2d2   :  { %v924_v55 = vunpack.i.h.bf16 %v922_v25  ;;  %v923_v50 = vunpack.i.l.bf16 %v922_v25 }
 0x2d4   :  { %v292_v51 = vsel %vm85_vm3, %v923_v50, %v924_v55  ;;  %v293_v57 = vsel %vm85_vm3, %v924_v55, %v923_v50 }
 0x2d8   :  { %971 = vrot.lane.b32.xlu2 %v975_v29, %s990_s16 }
 0x2d9   :  { %961 = vrot.lane.b32.xlu0 %v915_v49, %s991_s0 }
 0x2f4   :  { %v937_v16 = vpop.permute.xlu2 %936 }
 0x2f5   :  { %v939_v19 = vunpack.i.h.bf16 %v937_v16  ;;  %v938_v21 = vunpack.i.l.bf16 %v937_v16 }
 0x2f7   :  { %v314_v34 = vsel %vm92_vm4, %v938_v21, %v939_v19  ;;  %v315_v36 = vsel %vm92_vm4, %v939_v19, %v938_v21 }
 0x2fc   :  { %v942_v30 = vpop.permute.xlu2 %941 }
 0x2fd   :  { %v944_v43 = vunpack.i.h.bf16 %v942_v30  ;;  %v943_v44 = vunpack.i.l.bf16 %v942_v30 }
 0x2ff   :  { %v277_v59 = vsel %vm85_vm3, %v944_v43, %v943_v44  ;;  %v276_v16 = vsel %vm85_vm3, %v943_v44, %v944_v43 }
 0x30c   :  { %v947_v31 = vpop.permute.xlu1 %946 }
 0x30d   :  { %v927_v26 = vpop.permute.xlu0 %926  ;;  %v949_v45 = vunpack.i.h.bf16 %v947_v31  ;;  %v948_v46 = vunpack.i.l.bf16 %v947_v31 }
 0x30e   :  { %v929_v27 = vunpack.i.h.bf16 %v927_v26  ;;  %v928_v28 = vunpack.i.l.bf16 %v927_v26 }
 0x30f   :  { %v282_v60 = vsel %vm92_vm4, %v948_v46, %v949_v45  ;;  %v283_v61 = vsel %vm92_vm4, %v949_v45, %v948_v46 }
 0x310   :  { %v309_v32 = vsel %vm85_vm3, %v929_v27, %v928_v28  ;;  %v308_v35 = vsel %vm85_vm3, %v928_v28, %v929_v27  ;;  %v284_v25 = vsel %vm1140_vm8, %v282_v60, %v277_v59  ;;  %v286_v19 = vsel %vm1128_vm6, %v277_v59, %v282_v60 }
 0x311   :  { %v318_v39 = vsel %vm1128_vm6, %v309_v32, %v314_v34  ;;  %v319_v40 = vsel %vm1116_vm5, %v308_v35, %v315_v36  ;;  %v316_v52 = vsel %vm1140_vm8, %v314_v34, %v309_v32  ;;  %v317_v63 = vsel %vm1136_vm7, %v315_v36, %v308_v35 }
 0x312   :  { %v356_v41 = vpack.c.bf16 %v318_v39, %v318_v39  ;;  %v357_v42 = vpack.c.bf16 %v319_v40, %v319_v40  ;;  %v350_v26 = vsel %vm170_vm10, %v316_v52, %v340_v13  ;;  %v351_v28 = vsel %vm170_vm10, %v317_v63, %v341_v53 }
 0x313   :  { %v285_v32 = vsel %vm1136_vm7, %v283_v61, %v276_v16  ;;  %v287_v34 = vsel %vm1116_vm5, %v276_v16, %v283_v61  ;;  %v322_v35 = vrot.slane %v1316_v54, 4  ;;  %v1426_v54 = vld [vmem:[%s1520_s2] sm:$0x3] }
 0x314   :  { %v362_v47 = vsel %vm189_vm9, %v356_v41, 0  ;;  %v365_v49 = vsel %vm189_vm9, %v357_v42, 0  ;;  %v952_v41 = vpop.permute.xlu1 %951 }
 0x315   :  { %v932_v33 = vpop.permute.xlu0 %931  ;;  %372 = vmatpush.bf16.msra.mxu2 %v362_v47  ;;  %385 = vmatpush.bf16.msra.mxu3 %v365_v49  ;;  %v953_v59 = vunpack.i.l.bf16 %v952_v41 }
 0x316   :  { %v934_v17 = vunpack.i.h.bf16 %v932_v33  ;;  %v933_v14 = vunpack.i.l.bf16 %v932_v33 }
 0x318   :  { %v298_v56 = vsel %vm92_vm4, %v933_v14, %v934_v17  ;;  %v299_v62 = vsel %vm92_vm4, %v934_v17, %v933_v14 }
 0x319   :  { %v302_v1 = vsel %vm1128_vm6, %v293_v57, %v298_v56  ;;  %v303_v2 = vsel %vm1116_vm5, %v292_v51, %v299_v62  ;;  %v300_v3 = vsel %vm1140_vm8, %v298_v56, %v293_v57  ;;  %v301_v4 = vsel %vm1136_vm7, %v299_v62, %v292_v51 }
 0x31a   :  { %v334_v7 = vrot.slane %v302_v1, 4  ;;  %v335_v9 = vrot.slane %v303_v2, 4  ;;  %v328_v29 = vrot.slane %v300_v3, 4  ;;  %v329_v15 = vrot.slane %v301_v4, 4 }
 0x31b   :  { %v954_v57 = vunpack.i.h.bf16 %v952_v41  ;;  %v712_v4 = vrot.slane %v1330_v6, 4 }
 0x31c   :  { %v348_v21 = vsel %vm170_vm10, %v1279_v22, %v334_v7  ;;  %v349_v27 = vsel %vm170_vm10, %v1281_v24, %v335_v9  ;;  %v346_v36 = vsel %vm170_vm10, %v286_v19, %v328_v29  ;;  %v323_v22 = vrot.slane %v1304_v58, 4 }
 0x31d   :  { %v354_v30 = vpack.c.bf16 %v350_v26, %v348_v21  ;;  %v355_v31 = vpack.c.bf16 %v351_v28, %v349_v27  ;;  %v347_v39 = vsel %vm170_vm10, %v287_v34, %v329_v15  ;;  %v344_v24 = vsel %vm170_vm10, %v284_v25, %v322_v35 }
 0x31e   :  { %v345_v40 = vsel %vm170_vm10, %v285_v32, %v323_v22  ;;  %v352_v55 = vpack.c.bf16 %v346_v36, %v344_v24  ;;  %v664_v7 = vsel %vm85_vm3, %v953_v59, %v954_v57  ;;  %v713_v15 = vrot.slane %v1348_v38, 4 }
 0x31f   :  { %373 = vmatpush.bf16.msra.mxu2 %v354_v30  ;;  %386 = vmatpush.bf16.msra.mxu3 %v355_v31  ;;  %v353_v50 = vpack.c.bf16 %v347_v39, %v345_v40  ;;  %v665_v16 = vsel %vm85_vm3, %v954_v57, %v953_v59 }
 0x323   :  { %374 = vmatpush.bf16.msra.mxu2 %v352_v55  ;;  %387 = vmatpush.bf16.msra.mxu3 %v353_v50 }
 0x326   :  { %808 = vmatmul.msk.bf16.vlgmr.msra.gmra.mxu2 %vm185_vm11, %v1426_v54  ;;  %809 = vmatmul.msk.bf16.vlgmr.msra.gmra.mxu3 %vm185_vm11, %v1426_v54 }
 0x32a   :  { %v967_v58 = vpop.permute.xlu2 %966 }
 0x32b   :  { %v969_v42 = vunpack.i.h.bf16 %v967_v58  ;;  %v968_v43 = vunpack.i.l.bf16 %v967_v58 }
 0x32d   :  { %v686_v13 = vsel %vm92_vm4, %v968_v43, %v969_v42  ;;  %v687_v17 = vsel %vm92_vm4, %v969_v42, %v968_v43 }
 0x332   :  { %v972_v47 = vpop.permute.xlu2 %971 }
 0x333   :  { %v974_v56 = vunpack.i.h.bf16 %v972_v47  ;;  %v973_v62 = vunpack.i.l.bf16 %v972_v47 }
 0x335   :  { %v649_v25 = vsel %vm85_vm3, %v974_v56, %v973_v62  ;;  %v648_v39 = vsel %vm85_vm3, %v973_v62, %v974_v56 }
 0x342   :  { %v977_v49 = vpop.permute.xlu1 %976 }
 0x343   :  { %v957_v44 = vpop.permute.xlu0 %956  ;;  %v979_v52 = vunpack.i.h.bf16 %v977_v49  ;;  %v978_v63 = vunpack.i.l.bf16 %v977_v49 }
 0x344   :  { %v959_v45 = vunpack.i.h.bf16 %v957_v44  ;;  %v958_v46 = vunpack.i.l.bf16 %v957_v44 }
 0x345   :  { %v654_v19 = vsel %vm92_vm4, %v978_v63, %v979_v52  ;;  %v655_v21 = vsel %vm92_vm4, %v979_v52, %v978_v63 }
 0x346   :  { %v681_v33 = vsel %vm85_vm3, %v959_v45, %v958_v46  ;;  %v680_v51 = vsel %vm85_vm3, %v958_v46, %v959_v45  ;;  %v656_v24 = vsel %vm1140_vm8, %v654_v19, %v649_v25  ;;  %v658_v40 = vsel %vm1128_vm6, %v649_v25, %v654_v19 }
 0x347   :  { %v690_v14 = vsel %vm1128_vm6, %v681_v33, %v686_v13  ;;  %v691_v53 = vsel %vm1116_vm5, %v680_v51, %v687_v17  ;;  %v688_v38 = vsel %vm1140_vm8, %v686_v13, %v681_v33  ;;  %v689_v27 = vsel %vm1136_vm7, %v687_v17, %v680_v51 }
 0x348   :  { %v728_v60 = vpack.c.bf16 %v690_v14, %v690_v14  ;;  %v729_v61 = vpack.c.bf16 %v691_v53, %v691_v53  ;;  %v722_v50 = vsel %vm170_vm10, %v688_v38, %v712_v4  ;;  %v723_v41 = vsel %vm170_vm10, %v689_v27, %v713_v15 }
 0x349   :  { %v657_v23 = vsel %vm1136_vm7, %v655_v21, %v648_v39  ;;  %v659_v20 = vsel %vm1116_vm5, %v648_v39, %v655_v21 }
 0x34a   :  { %v731_v1 = vsel %vm189_vm9, %v728_v60, 0  ;;  %v734_v2 = vsel %vm189_vm9, %v729_v61, 0 }
 0x34b   :  { %v962_v3 = vpop.permute.xlu0 %961  ;;  %741 = vmatpush.bf16.msrb.mxu2 %v731_v1  ;;  %754 = vmatpush.bf16.msrb.mxu3 %v734_v2 }
 0x34c   :  { %v964_v9 = vunpack.i.h.bf16 %v962_v3  ;;  %v963_v29 = vunpack.i.l.bf16 %v962_v3 }
 0x34e   :  { %v670_v6 = vsel %vm92_vm4, %v963_v29, %v964_v9  ;;  %v671_v26 = vsel %vm92_vm4, %v964_v9, %v963_v29 }
 0x34f   :  { %v674_v28 = vsel %vm1128_vm6, %v665_v16, %v670_v6  ;;  %v675_v30 = vsel %vm1116_vm5, %v664_v7, %v671_v26  ;;  %v672_v31 = vsel %vm1140_vm8, %v670_v6, %v665_v16  ;;  %v673_v32 = vsel %vm1136_vm7, %v671_v26, %v664_v7 }
 0x350   :  { %v706_v34 = vrot.slane %v674_v28, 4  ;;  %v707_v35 = vrot.slane %v675_v30, 4  ;;  %v700_v36 = vrot.slane %v672_v31, 4  ;;  %v701_v22 = vrot.slane %v673_v32, 4 }
 0x352   :  { %v720_v55 = vsel %vm170_vm10, %v1287_v48, %v706_v34  ;;  %v721_v58 = vsel %vm170_vm10, %v1289_v37, %v707_v35  ;;  %v718_v44 = vsel %vm170_vm10, %v658_v40, %v700_v36  ;;  %v695_v48 = vrot.slane %v1336_v8, 4 }
 0x353   :  { %v726_v42 = vpack.c.bf16 %v722_v50, %v720_v55  ;;  %v727_v43 = vpack.c.bf16 %v723_v41, %v721_v58  ;;  %v719_v45 = vsel %vm170_vm10, %v659_v20, %v701_v22  ;;  %v716_v37 = vsel %vm170_vm10, %v656_v24, %v694_v10 }
 0x354   :  { %v717_v46 = vsel %vm170_vm10, %v657_v23, %v695_v48  ;;  %v724_v47 = vpack.c.bf16 %v718_v44, %v716_v37 }
 0x355   :  { %742 = vmatpush.bf16.msrb.mxu2 %v726_v42  ;;  %755 = vmatpush.bf16.msrb.mxu3 %v727_v43  ;;  %v725_v18 = vpack.c.bf16 %v719_v45, %v717_v46 }
 0x359   :  { %743 = vmatpush.bf16.msrb.mxu2 %v724_v47  ;;  %756 = vmatpush.bf16.msrb.mxu3 %v725_v18 }
 0x35c   :  { %813 = vmatmul.msk.bf16.vlgmr.msrb.gmra.mxu2 %vm185_vm11, %v1426_v54  ;;  %814 = vmatmul.msk.bf16.vlgmr.msrb.gmra.mxu3 %vm185_vm11, %v1426_v54 }
 0x3a9   :  { %v376_v5 = vpop.f32.mrf.mxu2  ;;  %v389_v8 = vpop.f32.mrf.mxu3 }
 0x3aa   :  { %v399_v11 = vmul.f32 %v376_v5, %v376_v5  ;;  %v400_v49 = vmul.f32 %v389_v8, %v389_v8  ;;  %v393_v33 = vsel %vm170_vm10, %v376_v5, 0.0  ;;  %v394_v13 = vsel %vm170_vm10, %v389_v8, 0.0 }
 0x3ab   :  { %v395_v51 = vadd.f32 %v394_v13, %v393_v33 }
 0x3ac   :  { %v401_v17 = vsel %vm170_vm10, %v399_v11, 0.0  ;;  %v402_v14 = vsel %vm170_vm10, %v400_v49, 0.0 }
 0x3ad   :  { %396 = vadd.xlane.f32.xlu0 %v395_v51  ;;  %v403_v53 = vadd.f32 %v402_v14, %v401_v17 }
 0x3af   :  { %404 = vadd.xlane.f32.xlu1 %v403_v53 }
 0x3b1   :  { %v378_v57 = vpop.f32.mrf.mxu2  ;;  %v391_v59 = vpop.f32.mrf.mxu3 }
 0x3df   :  { %v745_v60 = vpop.f32.mrf.mxu2  ;;  %v758_v54 = vpop.f32.mrf.mxu3 }
 0x3e0   :  { %v768_v61 = vmul.f32 %v745_v60, %v745_v60  ;;  %v769_v56 = vmul.f32 %v758_v54, %v758_v54  ;;  %v762_v62 = vsel %vm170_vm10, %v745_v60, 0.0  ;;  %v763_v52 = vsel %vm170_vm10, %v758_v54, 0.0 }
 0x3e1   :  { %v764_v63 = vadd.f32 %v763_v52, %v762_v62 }
 0x3e2   :  { %v770_v1 = vsel %vm170_vm10, %v768_v61, 0.0  ;;  %v771_v2 = vsel %vm170_vm10, %v769_v56, 0.0 }
 0x3e3   :  { %765 = vadd.xlane.f32.xlu2 %v764_v63  ;;  %v772_v3 = vadd.f32 %v771_v2, %v770_v1 }
 0x3e5   :  { %773 = vadd.xlane.f32.xlu0 %v772_v3 }
 0x3e7   :  { %v747_v4 = vpop.f32.mrf.mxu2  ;;  %v760_v7 = vpop.f32.mrf.mxu3 }
 0x420   :  { %v397_v9 = vpop.xlane.xlu0 %396 }
 0x421   :  { %v398_v29 = vmul.f32 0.00390625, %v397_v9 }
 0x422   :  { %v405_v15 = vpop.xlane.xlu1 %404 }
 0x423   :  { %v407_v16 = vmul.f32 %v398_v29, %v398_v29  ;;  %v406_v25 = vmul.f32 0.00390625, %v405_v15 }
 0x425   :  { %v408_v19 = vsub.f32 %v406_v25, %v407_v16 }
 0x427   :  { %v409_v21 = vadd.f32 1e-05, %v408_v19 }
 0x429   :  { %984 = vrsqrt.f32 %v409_v21  ;;  %vm416_vm0 = vweird.f32 %v409_v21 }
 0x42f   :  { %v985_v6 = vpop.eup %984 }
 0x430   :  { %v411_v26 = vmul.f32 %v985_v6, %v409_v21  ;;  %vm417_vm1 = vweird.f32 %v985_v6 }
 0x431   :  { %vm418_vm2 = vmor %vm416_vm0, %vm417_vm1 }
 0x432   :  { %v412_v38 = vmul.f32 %v985_v6, %v411_v26 }
 0x434   :  { %v413_v27 = vmul.f32 0.5, %v412_v38 }
 0x436   :  { %v414_v28 = vsub.f32 1.5, %v413_v27 }
 0x438   :  { %v415_v30 = vmul.f32 %v985_v6, %v414_v28 }
 0x43a   :  { %v419_v31 = vsel %vm418_vm2, %v985_v6, %v415_v30 }
 0x43b   :  { %v420_v32 = vmul.f32 %v419_v31, %v376_v5  ;;  %v421_v34 = vmul.f32 %v419_v31, %v389_v8  ;;  %v422_v35 = vmul.f32 %v419_v31, %v398_v29 }
 0x43d   :  { %v424_v36 = vsub.f32 %v421_v34, %v422_v35  ;;  %v423_v22 = vsub.f32 %v420_v32, %v422_v35 }
 0x43f   :  { %v427_v39 = vrot.slane %v424_v36, 4 }
 0x441   :  { %v428_v24 = vsel %vm170_vm10, %v423_v22, %v427_v39 }
 0x442   :  { %v430_v40 = vadd.f32 %v428_v24, %v1015_v0 }
 0x444   :  { %431 = vst [vmem:[%s1521_s3] sm:$0xff] %v430_v40 }
 0x456   :  { %v766_v55 = vpop.xlane.xlu2 %765 }
 0x457   :  { %v767_v50 = vmul.f32 0.00390625, %v766_v55 }
 0x458   :  { %v774_v58 = vpop.xlane.xlu0 %773 }
 0x459   :  { %v776_v41 = vmul.f32 %v767_v50, %v767_v50  ;;  %v775_v42 = vmul.f32 0.00390625, %v774_v58 }
 0x45b   :  { %v777_v43 = vsub.f32 %v775_v42, %v776_v41 }
 0x45d   :  { %v778_v23 = vadd.f32 1e-05, %v777_v43 }
 0x45f   :  { %986 = vrsqrt.f32 %v778_v23  ;;  %vm785_vm4 = vweird.f32 %v778_v23 }
 0x465   :  { %v987_v20 = vpop.eup %986 }
 0x466   :  { %v780_v10 = vmul.f32 %v987_v20, %v778_v23  ;;  %vm786_vm3 = vweird.f32 %v987_v20 }
 0x467   :  { %vm787_vm5 = vmor %vm785_vm4, %vm786_vm3 }
 0x468   :  { %v781_v44 = vmul.f32 %v987_v20, %v780_v10 }
 0x46a   :  { %v782_v48 = vmul.f32 0.5, %v781_v44 }
 0x46c   :  { %v783_v45 = vsub.f32 1.5, %v782_v48 }
 0x46e   :  { %v784_v37 = vmul.f32 %v987_v20, %v783_v45 }
 0x470   :  { %v788_v0 = vsel %vm787_vm5, %v987_v20, %v784_v37 }
 0x471   :  { %v789_v46 = vmul.f32 %v788_v0, %v745_v60  ;;  %v790_v47 = vmul.f32 %v788_v0, %v758_v54  ;;  %v791_v18 = vmul.f32 %v788_v0, %v767_v50 }
 0x473   :  { %v793_v5 = vsub.f32 %v790_v47, %v791_v18  ;;  %v792_v8 = vsub.f32 %v789_v46, %v791_v18 }
 0x475   :  { %v796_v11 = vrot.slane %v793_v5, 4 }
 0x477   :  { %v797_v49 = vsel %vm170_vm10, %v792_v8, %v796_v11 }
 0x478   :  { %v799_v33 = vadd.f32 %v1028_v12, %v797_v49 }
 0x47a   :  { %815 = vst [vmem:[%s1521_s3 + $0x8] sm:$0xff] %v799_v33 }

</bundles_post_ra>
